<compile_context>
chip_gen: v7x
topology: tpu7x:2x2x1
jax: 0.10.0
libtpu: 0.0.40
codegen_flags: <defaults>
</compile_context>

<pallas_src>
import jax
import jax.numpy as jnp
from jax.experimental import pallas as pl
from jax.experimental.pallas import tpu as pltpu


def _round_up(v, m):
    return ((v + m - 1) // m) * m


def time_embed_kernel(x_ref, w_ref, b_ref, o_ref):
    # x_ref: (tm, P*C), w_ref: (P*C, P*E), b_ref: (1, P*E), o_ref: (tm, P*E)
    acc = jnp.dot(x_ref[...], w_ref[...], preferred_element_type=jnp.float32)
    o_ref[...] = (acc + b_ref[...]).astype(o_ref.dtype)


def pack_time_embed_params(weight, bias, *, mxu_dtype=None, pack_rows=None):
    """Precompute (once per parameter set) the packed matmul operands.

    weight: (E, C_in, 1) Conv1d(kernel_size=1) weight.  bias: (E,).
    Returns (wp, bp, P, E, C):
      wp: (P*C, P*E) block-diagonal weight -- P consecutive logical rows are
          folded into one >=128-lane output row so stores are unmasked vst.
      bp: (1, P*E) f32 bias (bias add stays in f32 regardless of out dtype).
    """
    E, C, K = weight.shape
    assert K == 1, "Conv1d kernel_size must be 1 (patch_size=1)"
    w = weight.reshape(E, C).T                                    # (C, E)
    if mxu_dtype is not None:
        w = w.astype(mxu_dtype)

    if pack_rows is not None:
        P = int(pack_rows)
        assert P >= 1
    elif E < 128 and 128 % E == 0:
        P = 128 // E                    # lane-dense packing factor
    else:
        P = 1

    if P > 1:
        # Block-diagonal: Wp[p*C + c, q*E + e] = w[c, e] if p == q else 0.
        eye = jnp.eye(P, dtype=w.dtype)
        wp = jnp.einsum("pq,ce->pcqe", eye, w).reshape(P * C, P * E)
        bp = jnp.tile(bias.astype(jnp.float32).reshape(1, E), (1, P))
    else:
        wp = w
        bp = bias.astype(jnp.float32).reshape(1, E)
    return wp, bp, P, E, C


def time_embed(x, weight=None, bias=None, *, packed_params=None,
               tm=4096, out_dtype=None, mxu_dtype=None, x_buffer_count=2):
    """TimeEmbed forward: x (B, L, C_in) channels-last -> (B, L, E).

    Pass either (weight, bias) raw Conv1d params, or packed_params from
    pack_time_embed_params() (preferred: hoists packing out of the hot path).
    """
    B, L, C_in = x.shape
    if packed_params is None:
        packed_params = pack_time_embed_params(weight, bias, mxu_dtype=mxu_dtype)
    wp, bp, P, E, C = packed_params
    assert C == C_in, (C, C_in)
    out_dtype = x.dtype if out_dtype is None else jnp.dtype(out_dtype)

    M = B * L
    # Pad rows only to a multiple of P (<= P-1 rows) so the tail lanes of the
    # last packed row are zero.  The ragged last grid block is masked by
    # Pallas -- no pad-to-tile and (when M % P == 0) no output slice copy.
    pad_rows = (-M) % P
    M_pad = M + pad_rows
    Mp = M_pad // P

    xm = x.reshape(M, C)
    if wp.dtype != xm.dtype:
        xm = xm.astype(wp.dtype)         # e.g. bf16 MXU operands
    if pad_rows:
        xm = jnp.pad(xm, ((0, pad_rows), (0, 0)))
    xp = xm.reshape(Mp, P * C)           # free row-major reinterpretation

    # Row tile: large enough to amortize per-grid-step overhead, clamped to
    # the work size, f32-sublane aligned, and capped so grid_m >= 2 when the
    # problem allows (v7x has 2 TensorCores sharding the "parallel" axis).
    tm = max(8, (min(int(tm), _round_up(Mp, 8)) // 8) * 8)
    if Mp > 8:
        tm = min(tm, max(8, _round_up(pl.cdiv(Mp, 2), 8)))
    grid_m = pl.cdiv(Mp, tm)

    x_itemsize = jnp.dtype(wp.dtype).itemsize
    out_itemsize = out_dtype.itemsize
    # Double-buffered tile footprint + resident weight/bias + headroom; keeps
    # big tiles working under v5e's 16 MiB default scoped-VMEM limit.
    vmem_needed = (2 * tm * (P * C * x_itemsize + P * E * out_itemsize)
                   + wp.size * x_itemsize + bp.size * 4 + (2 << 20))
    vmem_limit = int(min(max(vmem_needed, 8 << 20), 32 << 20))

    if x_buffer_count != 2:
        # Deeper prefetch only if profiling shows exposed DMA on the x stream.
        x_spec = pl.BlockSpec((tm, P * C), lambda i: (i, 0),
                              pipeline_mode=pl.Buffered(x_buffer_count))
    else:
        x_spec = pl.BlockSpec((tm, P * C), lambda i: (i, 0))

    out = pl.pallas_call(
        time_embed_kernel,
        out_shape=jax.ShapeDtypeStruct((Mp, P * E), out_dtype),
        grid_spec=pltpu.PrefetchScalarGridSpec(
            num_scalar_prefetch=0,
            grid=(grid_m,),
            in_specs=[
                x_spec,                                           # row tile of x
                pl.BlockSpec((P * C, P * E), lambda i: (0, 0)),   # weight, resident
                pl.BlockSpec((1, P * E), lambda i: (0, 0)),       # bias, resident
            ],
            out_specs=pl.BlockSpec((tm, P * E), lambda i: (i, 0)),
        ),
        compiler_params=pltpu.CompilerParams(
            dimension_semantics=("parallel",),
            vmem_limit_bytes=vmem_limit,
        ),
        cost_estimate=pl.CostEstimate(
            flops=2 * Mp * (P * C) * (P * E),        # block-diagonal contraction
            transcendentals=0,
            bytes_accessed=(Mp * P * C * x_itemsize + wp.size * x_itemsize
                            + bp.size * 4 + Mp * P * E * out_itemsize),
        ),
    )(xp, wp, bp)

    out = out.reshape(M_pad, E)
    if pad_rows:
        out = out[:M]
    return out.reshape(B, L, E)


if __name__ == "__main__":
    # Small shapes consistent with TimeEmbed(input_size=16, in_chans=12, embed_dim=64).
    B, L, C_in, E = 2, 16, 12, 64

    key = jax.random.PRNGKey(0)
    kx, kw, kb = jax.random.split(key, 3)

    x = jax.random.normal(kx, (B, L, C_in), dtype=jnp.float32)
    # Conv1d parameters: weight (E, C_in, 1), bias (E,).
    weight = jax.random.normal(kw, (E, C_in, 1), dtype=jnp.float32) * 0.05
    bias = jax.random.normal(kb, (E,), dtype=jnp.float32) * 0.05

    # Pack the Conv1d parameters once (hoisted out of the hot path) and reuse.
    packed = pack_time_embed_params(weight, bias)

    out = jax.block_until_ready(time_embed(x, packed_params=packed))

    # Pure-JAX reference of the PyTorch forward (Identity norm_layer).
    ref = jnp.einsum("blc,ec->ble", x, weight.reshape(E, C_in)) + bias.reshape(1, 1, E)
    assert out.shape == (B, L, E), out.shape
    assert jnp.allclose(out, ref, atol=1e-5, rtol=1e-5), "mismatch vs reference"

    # Non-aligned row count: exercises the P-padding + ragged-last-block path.
    B2, L2 = 3, 37
    x2 = jax.random.normal(kx, (B2, L2, C_in), dtype=jnp.float32)
    out2 = jax.block_until_ready(time_embed(x2, packed_params=packed, tm=16))
    ref2 = jnp.einsum("blc,ec->ble", x2, weight.reshape(E, C_in)) + bias.reshape(1, 1, E)
    assert out2.shape == (B2, L2, E), out2.shape
    assert jnp.allclose(out2, ref2, atol=1e-5, rtol=1e-5), "mismatch vs reference (ragged path)"

    # Recommended production config: bf16 MXU operands + bf16 writeback
    # (f32 accumulation and f32 bias add are kept inside the kernel).
    packed_bf16 = pack_time_embed_params(weight, bias, mxu_dtype=jnp.bfloat16)
    out3 = jax.block_until_ready(
        time_embed(x, packed_params=packed_bf16, out_dtype=jnp.bfloat16))
    assert out3.dtype == jnp.bfloat16
    assert jnp.allclose(out3.astype(jnp.float32), ref, atol=3e-2, rtol=3e-2), \
        "mismatch vs reference (bf16 path)"

    print("KERNEL_OK")
</pallas_src>

<mosaic_0001>
module attributes {stable_mosaic.version = 11 : i64} {
  func.func @time_embed_kernel(%arg0: i32, %arg1: memref<8x24xf32, #tpu.memory_space<vmem>>, %arg2: memref<24x128xf32, #tpu.memory_space<vmem>>, %arg3: memref<1x128xf32, #tpu.memory_space<vmem>>, %arg4: memref<8x128xf32, #tpu.memory_space<vmem>>) attributes {dimension_semantics = [#tpu.dimension_semantics<parallel>], iteration_bounds = array<i64: 2>, scalar_prefetch = 0 : i64, scratch_operands = 0 : i64, tpu.core_type = #tpu.core_type<tc>, window_params = [{transform_indices = @transform_0, window_bounds = array<i64: 8, 24>}, {pipeline_mode = #tpu.pipeline_mode<synchronous>, transform_indices = @transform_1, window_bounds = array<i64: 24, 128>}, {pipeline_mode = #tpu.pipeline_mode<synchronous>, transform_indices = @transform_2, window_bounds = array<i64: 1, 128>}, {transform_indices = @transform_3, window_bounds = array<i64: 8, 128>}]} {
    %c0 = arith.constant 0 : index
    %c0_0 = arith.constant 0 : index
    %0 = vector.load %arg1[%c0, %c0_0] : memref<8x24xf32, #tpu.memory_space<vmem>>, vector<8x24xf32>
    %c0_1 = arith.constant 0 : index
    %c0_2 = arith.constant 0 : index
    %1 = vector.load %arg2[%c0_1, %c0_2] : memref<24x128xf32, #tpu.memory_space<vmem>>, vector<24x128xf32>
    %cst = arith.constant dense<0.000000e+00> : vector<8x128xf32>
    %2 = tpu.matmul %0, %1, %cst {dimension_numbers = #tpu.dot_dimension_numbers<[1], [0], [0], [1], [0, 0, 1, 1], [], []>} : vector<8x24xf32>, vector<24x128xf32>, vector<8x128xf32> -> vector<8x128xf32>
    %c0_3 = arith.constant 0 : index
    %c0_4 = arith.constant 0 : index
    %3 = vector.load %arg3[%c0_3, %c0_4] : memref<1x128xf32, #tpu.memory_space<vmem>>, vector<1x128xf32>
    %4 = vector.broadcast %3 : vector<1x128xf32> to vector<8x128xf32>
    %5 = arith.addf %2, %4 : vector<8x128xf32>
    %c0_5 = arith.constant 0 : index
    %c0_6 = arith.constant 0 : index
    %6 = vector.load %arg4[%c0_5, %c0_6] : memref<8x128xf32, #tpu.memory_space<vmem>>, vector<8x128xf32>
    tpu.vector_store %arg4[%c0_5, %c0_6], %5 {strides = array<i32>} : memref<8x128xf32, #tpu.memory_space<vmem>>, vector<8x128xf32>,
    return
  }
  func.func @transform_0(%arg0: i32) -> (i32, i32) {
    %c0_i32 = arith.constant 0 : i32
    %c0_i32_0 = arith.constant 0 : i32
    return %arg0, %c0_i32 : i32, i32
  }
  func.func @transform_1(%arg0: i32) -> (i32, i32) {
    %c0_i32 = arith.constant 0 : i32
    %c0_i32_0 = arith.constant 0 : i32
    %c0_i32_1 = arith.constant 0 : i32
    return %c0_i32, %c0_i32_0 : i32, i32
  }
  func.func @transform_2(%arg0: i32) -> (i32, i32) {
    %c0_i32 = arith.constant 0 : i32
    %c0_i32_0 = arith.constant 0 : i32
    %c0_i32_1 = arith.constant 0 : i32
    return %c0_i32, %c0_i32_0 : i32, i32
  }
  func.func @transform_3(%arg0: i32) -> (i32, i32) {
    %c0_i32 = arith.constant 0 : i32
    %c0_i32_0 = arith.constant 0 : i32
    return %arg0, %c0_i32 : i32, i32
  }
}

</mosaic_0001>

<bundles_post_ra>
// kernel: tpu_custom_call.1
= control target key start
LH: loop header
LB: loop body
LE: loop exit
PB: predicated region body
PF: predicated region fallthrough
CT: control target
= control target key end

     0   :  { %8 = vsyncpa [#allocation3], 0  ;;  %s832_s0 = inlined_call_operand.hbm [shape: f32[16,24], index: 0, kind: input, shape index: {}]   ;;  %s833_s1 = inlined_call_operand.hbm [shape: f32[24,128], index: 1, kind: input, shape index: {}]   ;;  %s834_s2 = inlined_call_operand.vmem [shape: f32[1,128], index: 2, kind: input, shape index: {}]   ;;  %s835_s3 = inlined_call_operand.hbm [shape: f32[16,128], index: 3, kind: output, shape index: {}]  }
   0x1   :  { %10 = vsyncpa [#allocation3 + $0x1], 0 }
   0x2   :  { %11 = vsyncpa [#allocation6], 0 }
   0x3   :  { %12 = vsyncpa [#allocation4], 0 }
   0x4   :  { %14 = vsyncpa [#allocation4 + $0x1], 0  ;;  %s633_s12 = smov 0   ;;  %s635_s13 = smov 0  }
   0x5   :  { %s637_s14 = smov 0   ;;  %s639_s15 = smov 0  }
   0x6 LB: > { %s654_s16 = sadd.s32 4294967295, %s603_s15   ;;  %s381_s17 = sadd.s32 4294967294, %s603_s15   ;;  %s603_s15 = sphi %s639_s15, %s855_s15   ;;  %s599_s14 = sphi %s637_s14, %s854_s14   ;;  %s595_s13 = sphi %s635_s13, %s853_s13   ;;  %s591_s12 = sphi %s633_s12, %s852_s12  }
   0x7   : > { %p40_p0 = scmp.ne.s32.totalorder %s595_s13, %s591_s12  ;;  %p836_p1 = scmp.eq.s32.totalorder %s654_s16, 0 }
   0x8   : > { %p112_p3 = scmp.eq.s32.totalorder %s381_s17, 1  ;;  %p382_p5 = scmp.ge.s32.totalorder %s603_s15, 1 }
   0x9   : > { %p663_p4 = por %p836_p1, %p40_p0  ;;  %p119_p7 = scmp.lt.s32.totalorder %s603_s15, 3 }
   0xa   : > { %p668_p6 = por %p112_p3, %p40_p0  ;;  %s605_s21 = smov [#allocation5]  }
   0xb   : > { %s839_s18 = scalar_select %p663_p4, 1, 0 }
   0xc   : > { %s840_s19 = scalar_select %p668_p6, 1, 0 }
   0xd   : > { %p673_p8 = pnand %p382_p5, %p119_p7  ;;  %s131_s22 = sshll.u32 %s605_s21, 4  ;;  %s677_s22 = int_to_ptr.vmem [resolvable:$true] %s131_s22 }
   0xe   : > { %s689_s24 = sadd.s32 1, %s603_s15   ;;  %s27_s25 = sadd.s32 1, %s599_s14 }
   0xf   : > { %s841_s20 = scalar_select %p673_p8, 1, 0 }
  0x10   : > { %p421_p9 = pneg %p673_p8  ;;  %s24_s26 = ssub.s32 %s603_s15, %s689_s24 }
  0x11   : > { %s475_s29 = scalar_lea.hbm %s833_s1, 384 }
  0x12   : > { %p684_p11 = pnand %p421_p9, %p836_p1  ;;  %p476_p12 = scmp.ne.s32.totalorder %s833_s1, %s475_s29 }
  0x13   : > { %p482_p5 = scmp.lt.u32.totalorder %s475_s29, %s833_s1 }
  0x14   : > { %p477_p13 = pneg %p684_p11 }
  0x16   : > { %p478_p0 = pnand %p477_p13, %p476_p12 }
  0x18   : > { %p479_p3 = pneg %p478_p0 }
  0x1a   : > { %p484_p7 = pnand %p482_p5, %p479_p3 }
  0x1c   : > { %487 = shalt.err (!%p484_p7)
}
  0x1d   : > { %s488_s7 = scalar_lea.vmem %s677_s22, 384  ;;  %p496_p2 = scmp.lt.s32.totalorder %s677_s22, %s677_s22 }
  0x1e   : > { %p489_p9 = scmp.ne.s32.totalorder %s677_s22, %s488_s7  ;;  %p497_p6 = scmp.lt.s32.totalorder %s488_s7, %s488_s7 }
  0x20   : > { %p491_p10 = pnand %p489_p9, %p477_p13  ;;  %p498_p4 = por %p497_p6, %p496_p2 }
  0x22   : > { %p492_p1 = pneg %p491_p10 }
  0x24   : > { %p499_p8 = pnand %p498_p4, %p492_p1 }
  0x26   : > { %502 = shalt.err (!%p499_p8)
}
  0x27   : > { %s606_s8 = smov 128   ;;  %s607_s9 = smov 8  }
  0x28   : > { %424 = dma.hbm_to_vmem [thread:$0]  (!%p684_p11), %s833_s1, 384, %s677_s22, [#allocation6], %s606_s8, %s606_s8, %s607_s9  }
  0x29   : > { %p25_p2 = scmp.eq.s32.totalorder %s24_s26, 0  ;;  %p34_p1 = scmp.ne.s32.totalorder %s599_s14, %s595_s13 }
  0x2a   : > { %p35_p4 = scmp.eq.s32.totalorder %s603_s15, 0  ;;  %p434_p6 = scmp.lt.s32.totalorder %s603_s15, 2 }
  0x2b   : > { %s720_s17 = scalar_select %p25_p2, %s599_s14, %s27_s25  }
  0x2c   : > { %p36_p8 = por %p35_p4, %p34_p1  ;;  %p843_p10 = scmp.eq.s32.totalorder %s654_s16, 1 }
  0x2d   : > { %s148_s27 = sand.u32 1, %s599_s14   ;;  %s386_s28 = sshll.u32 %s603_s15, 7 }
  0x2e   : > { %p724_p12 = por %p843_p10, %p34_p1  ;;  %s385_s29 = sshll.u32 %s148_s27, 3 }
  0x2f   : > { %s733_s4 = scalar_lea.hbm %s832_s0, %s386_s28  ;;  %s152_s22 = scalar_lea.vmem [#allocation2], %s385_s29 }
  0x30   : > { %s159_s25 = sshll.u32 %s152_s22, 4  ;;  %p735_p11 = pnand %p434_p6, %p36_p8  ;;  %s739_s25 = int_to_ptr.vmem [resolvable:$true] %s159_s25 }
  0x31   : > { %s149_s5 = scalar_lea.sflag [#allocation3], %s148_s27  ;;  %s503_s6 = scalar_lea.hbm %s733_s4, 128 }
  0x32   : > { %p504_p13 = scmp.ne.s32.totalorder %s733_s4, %s503_s6  ;;  %p505_p0 = pneg %p735_p11 }
  0x33   : > { %s508_s9 = scalar_lea.hbm %s832_s0, 256  ;;  %p509_p7 = scmp.lt.u32.totalorder %s733_s4, %s832_s0 }
  0x34   : > { %p506_p3 = pnand %p505_p0, %p504_p13  ;;  %p510_p9 = scmp.lt.u32.totalorder %s508_s9, %s503_s6 }
  0x35   : > { %p512_p1 = scmp.lt.u32.totalorder %s503_s6, %s733_s4 }
  0x36   : > { %p507_p5 = pneg %p506_p3  ;;  %p511_p2 = por %p510_p9, %p509_p7 }
  0x38   : > { %p513_p4 = por %p512_p1, %p511_p2 }
  0x3a   : > { %p514_p6 = pnand %p513_p4, %p507_p5 }
  0x3c   : > { %517 = shalt.err (!%p514_p6)
}
  0x3d   : > { %s518_s27 = scalar_lea.vmem %s739_s25, 128  ;;  %s608_s28 = smov [#allocation2]  }
  0x3e   : > { %p519_p8 = scmp.ne.s32.totalorder %s739_s25, %s518_s27  ;;  %s523_s29 = sshll.u32 %s608_s28, 4  ;;  %s524_s29 = int_to_ptr.vmem [resolvable:$false] %s523_s29 }
  0x3f   : > { %s525_s23 = scalar_lea.vmem %s524_s29, 256  ;;  %p526_p3 = scmp.lt.s32.totalorder %s739_s25, %s524_s29 }
  0x40   : > { %p521_p10 = pnand %p519_p8, %p505_p0  ;;  %p527_p7 = scmp.lt.s32.totalorder %s525_s23, %s518_s27 }
  0x42   : > { %p522_p13 = pneg %p521_p10  ;;  %p528_p9 = por %p527_p7, %p526_p3 }
  0x44   : > { %p529_p2 = pnand %p528_p9, %p522_p13 }
  0x46   : > { %532 = shalt.err (!%p529_p2)
}
  0x47   : > { %428 = dma.hbm_to_vmem [thread:$0]  (!%p735_p11), %s733_s4, 128, %s739_s25, %s149_s5  }
  0x48   : > { %p846_p5 = scmp.ne.s32.totalorder %s841_s20, 0 }
  0x49   : > { %s769_s30 = sand.u32 (!%p846_p5), 1, %s595_s13   ;;  %p847_p0 = scmp.ne.s32.totalorder (!%p846_p5), %s839_s18, 0 }
  0x4a   : > { %168 = sbr.rel (%p846_p5) target bundleno = 321 (0x141), region = 32  ;;  %s388_s22 = sshll.u32 (!%p846_p5), %s769_s30, 3 }
  0x4b   : > { %s171_s6 = scalar_lea.sflag (!%p846_p5), [#allocation3], %s769_s30  ;;  %s174_s7 = scalar_lea.vmem (!%p846_p5), [#allocation2], %s388_s22 }
  0x51   : > { %578 = dma.done.wait (%p847_p0), %s171_s6, 128  }
  0x52   : > { %580 = vsyncadd (%p847_p0), %s171_s6, 4294967168  ;;  %p848_p1 = scmp.eq.s32.totalorder %s654_s16, 0 }
  0x54   : > { %582 = dma.done.wait (%p848_p1), [#allocation6], 384   ;;  %p849_p11 = pmov %p848_p1 }
  0x55   : > { %v609_v0 = vmov 0.0|0.0   ;;  %vm610_vm0 = vmmov 0   ;;  %v611_v1 = vmov 0.0   ;;  %v202_v2 = vld [vmem:[#allocation5] sm:$0xff]  ;;  %v203_v3 = vld [vmem:[#allocation5 + $0x8] sm:$0xff]  ;;  %v204_v5 = vld [vmem:[#allocation5 + $0x10] sm:$0xff] }
  0x56   : > { %584 = vsyncadd (%p849_p11), [#allocation6], 4294966912  ;;  %410 = vmatprep.subr.bf16.mxu0 %v609_v0  ;;  %407 = vmatprep.mubr.msk.f32.mxu0 %vm610_vm0, %v611_v1  ;;  %v411_v4 = vpack.c.bf16 %v203_v3, %v202_v2  ;;  %v201_v6 = vld [vmem:[%s174_s7] sm:$0xff]  ;;  %vm212_vm1 = vcmask 195584   ;;  %s394_s4 = sshll.u32 %s654_s16, 7  ;;  %s200_s25 = scalar_lea.vmem [#allocation7], %s388_s22 }
  0x57   : > { %v391_v7 = vld [vmem:[%s834_s2] ss:$0 sm:$0xff]  ;;  %s301_s26 = sshll.u32 %s200_s25, 4  ;;  %s788_s9 = scalar_lea.hbm %s835_s3, %s394_s4  ;;  %s790_s26 = int_to_ptr.vmem [resolvable:$true] %s301_s26 }
  0x58   : > { %412 = vmatpush3.bf16.msra.mxu0 %v411_v4  ;;  %s288_s10 = scalar_lea.sflag [#allocation4], %s769_s30  ;;  %s533_s11 = scalar_lea.vmem %s790_s26, 128 }
  0x59   : > { %405 = vmatprep.subr.mxu0 %v611_v1  ;;  %p534_p4 = scmp.ne.s32.totalorder %s790_s26, %s533_s11  ;;  %s612_s16 = smov [#allocation7]  }
  0x5a   : > { %s537_s27 = sshll.u32 %s612_s16, 4  ;;  %s538_s27 = int_to_ptr.vmem [resolvable:$false] %s537_s27 }
  0x5b   : > { %p535_p6 = pnand %p534_p4, %p724_p12  ;;  %s539_s28 = scalar_lea.vmem %s538_s27, 256 }
  0x5c   : > { %406 = vmatpush3.msra.mxu0 %v204_v5  ;;  %p540_p10 = scmp.lt.s32.totalorder %s790_s26, %s538_s27  ;;  %p541_p13 = scmp.lt.s32.totalorder %s539_s28, %s533_s11 }
  0x5d   : > { %408 = vmatmul.mubr.msk.f32.vlgmr.msra.gmra.mrb[0].mxu0 %vm212_vm1, %v201_v6  ;;  %p536_p8 = pneg %p535_p6 }
  0x5e   : > { %p542_p3 = por %p541_p13, %p540_p10 }
  0x60   : > { %p543_p7 = pnand %p542_p3, %p536_p8 }
 0x130   : > { %v282_v8 = vpop.f32.mrb[0].mxu0 }
 0x131   : > { %v283_v9 = vadd.f32 %v391_v7, %v282_v8  ;;  %v409_v10 = vpop.f32.mrb[1].mxu0 }
 0x133   : > { %286 = vst [vmem:[%s200_s25] sm:$0xff] %v283_v9 }
 0x134   : > { %546 = shalt.err (!%p543_p7)
}
 0x135   : > { %s547_s29 = scalar_lea.hbm %s788_s9, 128  ;;  %s551_s22 = scalar_lea.hbm %s835_s3, 256 }
 0x136   : > { %p548_p9 = scmp.ne.s32.totalorder %s788_s9, %s547_s29  ;;  %p552_p0 = scmp.lt.u32.totalorder %s788_s9, %s835_s3 }
 0x137   : > { %p553_p1 = scmp.lt.u32.totalorder %s551_s22, %s547_s29  ;;  %p555_p4 = scmp.lt.u32.totalorder %s547_s29, %s788_s9 }
 0x138   : > { %p549_p2 = pnand %p548_p9, %p724_p12 }
 0x139   : > { %p554_p11 = por %p553_p1, %p552_p0 }
 0x13a   : > { %p550_p5 = pneg %p549_p2 }
 0x13b   : > { %p556_p6 = por %p555_p4, %p554_p11 }
 0x13d   : > { %p557_p8 = pnand %p556_p6, %p550_p5 }
 0x13f   : > { %560 = shalt.err (!%p557_p8)
}
 0x140   : > { %419 = dma.vmem_to_hbm [thread:$0]  (%p724_p12), %s790_s26, 128, %s788_s9, %s288_s10  }
 0x141 PF: > { %s313_s18 = sand.u32 1, %s591_s12   ;;  %p850_p10 = scmp.ne.s32.totalorder %s840_s19, 0 }
 0x142   : > { %p851_p13 = scmp.ge.s32.totalorder %s603_s15, 2  ;;  %s314_s20 = scalar_lea.sflag [#allocation4], %s313_s18 }
 0x144   : > { %p430_p3 = pnand %p851_p13, %p850_p10 }
 0x146   : > { %586 = dma.done.wait (!%p430_p3), %s314_s20, 128  }
 0x147   : > { %588 = vsyncadd (!%p430_p3), %s314_s20, 4294967168  ;;  %p17_p7 = scmp.ge.s32.totalorder %s689_s24, 4   ;;  %s852_s12 = smov %s595_s13 }
 0x148   : > { %s853_s13 = smov %s599_s14  ;;  %s854_s14 = smov %s720_s17 }
 0x149   : > { %s855_s15 = smov %s689_s24  ;;  %19 = sbr.rel (!%p17_p7) target bundleno = 6 (0x6), region = 81 }
 0x150   :  { %319 = vsyncpa [#allocation3], 1 }
 0x151   :  { %321 = vsyncpa [#allocation3 + $0x1], 1 }
 0x152   :  { %322 = vsyncpa [#allocation6], 1 }
 0x153   :  { %323 = vsyncpa [#allocation4], 1 }
 0x154   :  { %325 = vsyncpa [#allocation4 + $0x1], 1 }

</bundles_post_ra>
